<compile_context>
chip_gen: v7x
topology: tpu7x:2x2x1
jax: 0.10.0
libtpu: 0.0.40
codegen_flags: <defaults>
</compile_context>

<pallas_src>
import jax
import jax.numpy as jnp
from jax import lax
from jax.experimental import pallas as pl
from jax.experimental.pallas import tpu as pltpu


_EPS = 1e-5


# ----------------------------------------------------------------------------
# Fused Pallas kernel: embedding + 3x (conv1d -> ReLU -> batchnorm)
# ----------------------------------------------------------------------------
def _make_fused_kernel(B, L, kernel_sizes, channels):
    """Build the fused kernel for static (B, L, kernel sizes, channel counts).

    In-kernel activation layout is (B*L, C): batch*length on sublanes (constant batch
    stride of L rows across layers), channels on lanes.  Rows whose within-batch position
    >= the layer's valid length are garbage (conv windows that crossed a batch boundary);
    they are masked out of the BatchNorm statistics, never read by valid windows of later
    layers, and skipped by the final store.
    """
    BL = B * L

    def kernel(tok_ref, pos_ref, emb_ref, *rest):
        # rest = [w1, b1, g1, be1, w2, b2, g2, be2, w3, b3, g3, be3, o_ref]
        param_refs, o_ref = rest[:-1], rest[-1]
        n_tok = emb_ref.shape[0]                                     # 26

        # ---- Embedding lookup as a one-hot MXU matmul (padding_idx=0 row is zero). ----
        tok = tok_ref[...]                                           # (BL, 1) int32
        col_ids = lax.broadcasted_iota(jnp.int32, (BL, n_tok), 1)    # lane iota
        onehot = (col_ids == tok).astype(jnp.float32)                # (BL, 26)
        # HIGHEST keeps the gathered embedding rows exact; this matmul is only 26-deep so
        # the extra MXU passes are negligible (the convs below use DEFAULT precision).
        act = jnp.dot(onehot, emb_ref[...],
                      preferred_element_type=jnp.float32,
                      precision=lax.Precision.HIGHEST)               # (BL, E)

        pos = pos_ref[...]                                           # (BL, 1) within-batch idx

        l_valid = L
        for li, k in enumerate(kernel_sizes):
            w_ref, b_ref, g_ref, be_ref = param_refs[4 * li: 4 * li + 4]
            c_in, c_out = channels[li], channels[li + 1]
            l_out = l_valid - k + 1

            w = w_ref[...]                                           # (K*Cin, Cout) tap-major
            # Pad (k-1) zero rows so every tap's sublane-shifted view is full width.
            xp = jnp.concatenate([act, jnp.zeros((k - 1, c_in), jnp.float32)], axis=0)

            # ---- Conv1d (valid) as K accumulating Cin-deep matmuls, DEFAULT precision
            #      (single-pass bf16 MXU, f32 accumulation). No K-times operand copy. ----
            y = jnp.dot(act, w[:c_in, :], preferred_element_type=jnp.float32)
            for t in range(1, k):
                y = y + jnp.dot(xp[t:t + BL, :], w[t * c_in:(t + 1) * c_in, :],
                                preferred_element_type=jnp.float32)
            y = jnp.maximum(y + b_ref[...], 0.0)                     # bias + ReLU, (BL, Cout)

            # Zero garbage rows (cross-batch windows) so BN sums see only valid positions.
            y = jnp.where(pos < l_out, y, 0.0)

            # ---- BatchNorm1d (training), single pass: sum & sum-of-squares. ----
            count = float(B * l_out)
            mean = jnp.sum(y, axis=0, keepdims=True) / count         # (1, Cout)
            var = jnp.maximum(
                jnp.sum(y * y, axis=0, keepdims=True) / count - mean * mean, 0.0)
            scale = lax.rsqrt(var + _EPS) * g_ref[...]               # (1, Cout), rsqrt -> EUP
            shift = be_ref[...] - mean * scale
            act = y * scale + shift                                  # (BL, Cout)
            l_valid = l_out

        # ---- Store (B, L_out, C_out): channels lane-dense, no wrapper transpose. ----
        for b in range(B):
            o_ref[b] = act[b * L: b * L + l_valid, :].astype(o_ref.dtype)

    return kernel


# ----------------------------------------------------------------------------
# Parameters (PyTorch layouts) and forward wrapper
# ----------------------------------------------------------------------------
def init_params(key, embedding_dim, num_filters, kernel_size):
    """Parameters in PyTorch layout: conv weight (Cout, Cin, K), bias (Cout,)."""
    in_ch = [embedding_dim] + list(num_filters)
    keys = jax.random.split(key, 7)
    emb = jax.random.normal(keys[0], (26, embedding_dim), jnp.float32)
    emb = emb.at[0].set(0.0)                                         # padding_idx=0
    params = {"embedding": emb, "convs": [], "bns": []}
    for li in range(3):
        cin, cout, k = in_ch[li], in_ch[li + 1], kernel_size[li]
        bound = (cin * k) ** -0.5
        w = jax.random.uniform(keys[1 + 2 * li], (cout, cin, k), jnp.float32, -bound, bound)
        b = jax.random.uniform(keys[2 + 2 * li], (cout,), jnp.float32, -bound, bound)
        params["convs"].append((w, b))
        # PyTorch BatchNorm1d affine init: gamma=1, beta=0.
        params["bns"].append((jnp.ones((cout,), jnp.float32), jnp.zeros((cout,), jnp.float32)))
    return params


@jax.jit
def protein_cnn_forward(params, tokens):
    """tokens: (B, L) int -> (B, L_out, C_out), matching the PyTorch module's output."""
    B, L = tokens.shape
    emb = params["embedding"].astype(jnp.float32)                    # (26, E)

    channels = [emb.shape[1]]
    kernel_sizes = []
    args = [tokens.reshape(B * L, 1).astype(jnp.int32),
            (jnp.arange(B * L, dtype=jnp.int32) % L).reshape(B * L, 1),
            emb]
    l_out = L
    for (w, b), (g, beta) in zip(params["convs"], params["bns"]):
        c_out, c_in, k = w.shape
        kernel_sizes.append(k)
        channels.append(c_out)
        # torch (Cout, Cin, K) -> (K*Cin, Cout): row t*Cin + c holds w[:, c, t], matching
        # the in-kernel tap-major accumulation order.
        w_kc = jnp.transpose(w, (2, 1, 0)).reshape(k * c_in, c_out)
        args += [w_kc, b.reshape(1, c_out), g.reshape(1, c_out), beta.reshape(1, c_out)]
        l_out = l_out - k + 1

    kernel = _make_fused_kernel(B, L, tuple(kernel_sizes), tuple(channels))
    vmem = pl.BlockSpec(memory_space=pltpu.MemorySpace.VMEM)         # whole array VMEM-resident
    # TODO(synk): bf16 activation storage (f32 accumulation) would further halve VMEM/HBM
    #             traffic on v6e/v7x; kept f32 so the numerical check stays tight.
    return pl.pallas_call(
        kernel,
        out_shape=jax.ShapeDtypeStruct((B, l_out, channels[-1]), jnp.float32),
        in_specs=[vmem] * len(args),
        out_specs=vmem,
        compiler_params=pltpu.CompilerParams(vmem_limit_bytes=32 * 1024 * 1024),
    )(*args)


# ----------------------------------------------------------------------------
# Pure-JAX reference (mirrors PyTorch NCL semantics; DEFAULT matmul precision like kernel)
# ----------------------------------------------------------------------------
def reference_forward(params, tokens):
    v = jnp.take(params["embedding"], tokens.astype(jnp.int32), axis=0)  # (B, L, E)
    v = jnp.transpose(v, (0, 2, 1))                                      # (B, E, L)
    for (w, b), (g, beta) in zip(params["convs"], params["bns"]):
        v = lax.conv_general_dilated(
            v, w, window_strides=(1,), padding="VALID",
            dimension_numbers=("NCH", "OIH", "NCH"))
        v = jnp.maximum(v + b[None, :, None], 0.0)
        mean = jnp.mean(v, axis=(0, 2), keepdims=True)
        var = jnp.mean(jnp.square(v - mean), axis=(0, 2), keepdims=True)
        v = (v - mean) * lax.rsqrt(var + _EPS) * g[None, :, None] + beta[None, :, None]
    return jnp.transpose(v, (0, 2, 1))                                   # (B, L_out, C_out)


if __name__ == "__main__":
    key = jax.random.PRNGKey(0)
    k_tok, k_par = jax.random.split(key)

    # Small, module-consistent config.
    B, L = 2, 16
    embedding_dim = 8
    num_filters = [16, 16, 32]
    kernel_size = [3, 3, 3]

    tokens = jax.random.randint(k_tok, (B, L), 0, 26, dtype=jnp.int32)
    params = init_params(k_par, embedding_dim, num_filters, kernel_size)

    out = jax.block_until_ready(protein_cnn_forward(params, tokens))

    expected_len = L - sum(k - 1 for k in kernel_size)
    assert out.shape == (B, expected_len, num_filters[-1]), out.shape

    ref = jax.block_until_ready(reference_forward(params, tokens))
    max_err = float(jnp.max(jnp.abs(out - ref)))
    # Both sides run their matmuls at DEFAULT (single-pass bf16 MXU) precision; the slack
    # covers bf16 rounding / accumulation-order differences between Mosaic and XLA.
    assert max_err < 2e-2, f"mismatch vs reference: {max_err}"

    print("KERNEL_OK")
</pallas_src>

<mosaic_0001>
module attributes {stable_mosaic.version = 11 : i64} {
  func.func @kernel(%arg0: memref<32x1xi32, #tpu.memory_space<vmem>>, %arg1: memref<32x1xi32, #tpu.memory_space<vmem>>, %arg2: memref<26x8xf32, #tpu.memory_space<vmem>>, %arg3: memref<24x16xf32, #tpu.memory_space<vmem>>, %arg4: memref<1x16xf32, #tpu.memory_space<vmem>>, %arg5: memref<1x16xf32, #tpu.memory_space<vmem>>, %arg6: memref<1x16xf32, #tpu.memory_space<vmem>>, %arg7: memref<48x16xf32, #tpu.memory_space<vmem>>, %arg8: memref<1x16xf32, #tpu.memory_space<vmem>>, %arg9: memref<1x16xf32, #tpu.memory_space<vmem>>, %arg10: memref<1x16xf32, #tpu.memory_space<vmem>>, %arg11: memref<48x32xf32, #tpu.memory_space<vmem>>, %arg12: memref<1x32xf32, #tpu.memory_space<vmem>>, %arg13: memref<1x32xf32, #tpu.memory_space<vmem>>, %arg14: memref<1x32xf32, #tpu.memory_space<vmem>>, %arg15: memref<2x10x32xf32, #tpu.memory_space<vmem>>) attributes {dimension_semantics = [], scalar_prefetch = 0 : i64, scratch_operands = 0 : i64, tpu.core_type = #tpu.core_type<tc>} {
    %c0 = arith.constant 0 : index
    %c0_0 = arith.constant 0 : index
    %0 = vector.load %arg0[%c0, %c0_0] : memref<32x1xi32, #tpu.memory_space<vmem>>, vector<32x1xi32>
    %1 = tpu.iota {dimensions = array<i32: 1>} : vector<32x26xi32>
    %2 = vector.broadcast %0 : vector<32x1xi32> to vector<32x26xi32>
    %3 = arith.cmpi eq, %1, %2 : vector<32x26xi32>
    %4 = arith.extui %3 : vector<32x26xi1> to vector<32x26xi32>
    %5 = arith.sitofp %4 : vector<32x26xi32> to vector<32x26xf32>
    %c0_1 = arith.constant 0 : index
    %c0_2 = arith.constant 0 : index
    %6 = vector.load %arg2[%c0_1, %c0_2] : memref<26x8xf32, #tpu.memory_space<vmem>>, vector<26x8xf32>
    %cst = arith.constant dense<0.000000e+00> : vector<32x8xf32>
    %7 = tpu.matmul %5, %6, %cst {dimension_numbers = #tpu.dot_dimension_numbers<[1], [0], [0], [1], [0, 0, 1, 1], [], []>, precision = #tpu.contract_precision<fp32>} : vector<32x26xf32>, vector<26x8xf32>, vector<32x8xf32> -> vector<32x8xf32>
    %c0_3 = arith.constant 0 : index
    %c0_4 = arith.constant 0 : index
    %8 = vector.load %arg1[%c0_3, %c0_4] : memref<32x1xi32, #tpu.memory_space<vmem>>, vector<32x1xi32>
    %c0_5 = arith.constant 0 : index
    %c0_6 = arith.constant 0 : index
    %9 = vector.load %arg3[%c0_5, %c0_6] : memref<24x16xf32, #tpu.memory_space<vmem>>, vector<24x16xf32>
    %cst_7 = arith.constant 0.000000e+00 : f32
    %10 = vector.broadcast %cst_7 : f32 to vector<2x8xf32>
    %11 = tpu.concatenate %7, %10 in 0 : vector<32x8xf32>, vector<2x8xf32> -> vector<34x8xf32>
    %12 = vector.extract_strided_slice %9 {offsets = [0, 0], sizes = [8, 16], strides = [1, 1]} : vector<24x16xf32> to vector<8x16xf32>
    %cst_8 = arith.constant dense<0.000000e+00> : vector<32x16xf32>
    %13 = tpu.matmul %7, %12, %cst_8 {dimension_numbers = #tpu.dot_dimension_numbers<[1], [0], [0], [1], [0, 0, 1, 1], [], []>} : vector<32x8xf32>, vector<8x16xf32>, vector<32x16xf32> -> vector<32x16xf32>
    %14 = vector.extract_strided_slice %11 {offsets = [1, 0], sizes = [32, 8], strides = [1, 1]} : vector<34x8xf32> to vector<32x8xf32>
    %15 = vector.extract_strided_slice %9 {offsets = [8, 0], sizes = [8, 16], strides = [1, 1]} : vector<24x16xf32> to vector<8x16xf32>
    %cst_9 = arith.constant dense<0.000000e+00> : vector<32x16xf32>
    %16 = tpu.matmul %14, %15, %cst_9 {dimension_numbers = #tpu.dot_dimension_numbers<[1], [0], [0], [1], [0, 0, 1, 1], [], []>} : vector<32x8xf32>, vector<8x16xf32>, vector<32x16xf32> -> vector<32x16xf32>
    %17 = arith.addf %13, %16 : vector<32x16xf32>
    %18 = vector.extract_strided_slice %11 {offsets = [2, 0], sizes = [32, 8], strides = [1, 1]} : vector<34x8xf32> to vector<32x8xf32>
    %19 = vector.extract_strided_slice %9 {offsets = [16, 0], sizes = [8, 16], strides = [1, 1]} : vector<24x16xf32> to vector<8x16xf32>
    %cst_10 = arith.constant dense<0.000000e+00> : vector<32x16xf32>
    %20 = tpu.matmul %18, %19, %cst_10 {dimension_numbers = #tpu.dot_dimension_numbers<[1], [0], [0], [1], [0, 0, 1, 1], [], []>} : vector<32x8xf32>, vector<8x16xf32>, vector<32x16xf32> -> vector<32x16xf32>
    %21 = arith.addf %17, %20 : vector<32x16xf32>
    %c0_11 = arith.constant 0 : index
    %c0_12 = arith.constant 0 : index
    %22 = vector.load %arg4[%c0_11, %c0_12] : memref<1x16xf32, #tpu.memory_space<vmem>>, vector<1x16xf32>
    %23 = vector.broadcast %22 : vector<1x16xf32> to vector<32x16xf32>
    %24 = arith.addf %21, %23 : vector<32x16xf32>
    %cst_13 = arith.constant 0.000000e+00 : f32
    %25 = vector.broadcast %cst_13 : f32 to vector<32x16xf32>
    %26 = arith.maximumf %24, %25 : vector<32x16xf32>
    %c14_i32 = arith.constant 14 : i32
    %27 = vector.broadcast %c14_i32 : i32 to vector<32x1xi32>
    %28 = arith.cmpi slt, %8, %27 : vector<32x1xi32>
    %cst_14 = arith.constant 0.000000e+00 : f32
    %29 = vector.shape_cast %28 : vector<32x1xi1> to vector<32x1xi1>
    %30 = vector.broadcast %29 : vector<32x1xi1> to vector<32x16xi1>
    %31 = vector.broadcast %cst_14 : f32 to vector<32x16xf32>
    %32 = arith.select %30, %26, %31 : vector<32x16xi1>, vector<32x16xf32>
    %cst_15 = arith.constant dense<0.000000e+00> : vector<16xf32>
    %33 = vector.multi_reduction <add>, %32, %cst_15 [0] : vector<32x16xf32> to vector<16xf32>
    %34 = vector.shape_cast %33 : vector<16xf32> to vector<1x16xf32>
    %cst_16 = arith.constant 2.800000e+01 : f32
    %35 = vector.broadcast %cst_16 : f32 to vector<1x16xf32>
    %36 = arith.divf %34, %35 : vector<1x16xf32>
    %37 = arith.mulf %32, %32 : vector<32x16xf32>
    %cst_17 = arith.constant dense<0.000000e+00> : vector<16xf32>
    %38 = vector.multi_reduction <add>, %37, %cst_17 [0] : vector<32x16xf32> to vector<16xf32>
    %39 = vector.shape_cast %38 : vector<16xf32> to vector<1x16xf32>
    %cst_18 = arith.constant 2.800000e+01 : f32
    %40 = vector.broadcast %cst_18 : f32 to vector<1x16xf32>
    %41 = arith.divf %39, %40 : vector<1x16xf32>
    %42 = arith.mulf %36, %36 : vector<1x16xf32>
    %43 = arith.subf %41, %42 : vector<1x16xf32>
    %cst_19 = arith.constant 0.000000e+00 : f32
    %44 = vector.broadcast %cst_19 : f32 to vector<1x16xf32>
    %45 = arith.maximumf %43, %44 : vector<1x16xf32>
    %cst_20 = arith.constant 9.99999974E-6 : f32
    %46 = vector.broadcast %cst_20 : f32 to vector<1x16xf32>
    %47 = arith.addf %45, %46 : vector<1x16xf32>
    %48 = math.rsqrt %47 : vector<1x16xf32>
    %c0_21 = arith.constant 0 : index
    %c0_22 = arith.constant 0 : index
    %49 = vector.load %arg5[%c0_21, %c0_22] : memref<1x16xf32, #tpu.memory_space<vmem>>, vector<1x16xf32>
    %50 = arith.mulf %48, %49 : vector<1x16xf32>
    %c0_23 = arith.constant 0 : index
    %c0_24 = arith.constant 0 : index
    %51 = vector.load %arg6[%c0_23, %c0_24] : memref<1x16xf32, #tpu.memory_space<vmem>>, vector<1x16xf32>
    %52 = arith.mulf %36, %50 : vector<1x16xf32>
    %53 = arith.subf %51, %52 : vector<1x16xf32>
    %54 = vector.broadcast %50 : vector<1x16xf32> to vector<32x16xf32>
    %55 = arith.mulf %32, %54 : vector<32x16xf32>
    %56 = vector.broadcast %53 : vector<1x16xf32> to vector<32x16xf32>
    %57 = arith.addf %55, %56 : vector<32x16xf32>
    %c0_25 = arith.constant 0 : index
    %c0_26 = arith.constant 0 : index
    %58 = vector.load %arg7[%c0_25, %c0_26] : memref<48x16xf32, #tpu.memory_space<vmem>>, vector<48x16xf32>
    %cst_27 = arith.constant 0.000000e+00 : f32
    %59 = vector.broadcast %cst_27 : f32 to vector<2x16xf32>
    %60 = tpu.concatenate %57, %59 in 0 : vector<32x16xf32>, vector<2x16xf32> -> vector<34x16xf32>
    %61 = vector.extract_strided_slice %58 {offsets = [0, 0], sizes = [16, 16], strides = [1, 1]} : vector<48x16xf32> to vector<16x16xf32>
    %cst_28 = arith.constant dense<0.000000e+00> : vector<32x16xf32>
    %62 = tpu.matmul %57, %61, %cst_28 {dimension_numbers = #tpu.dot_dimension_numbers<[1], [0], [0], [1], [0, 0, 1, 1], [], []>} : vector<32x16xf32>, vector<16x16xf32>, vector<32x16xf32> -> vector<32x16xf32>
    %63 = vector.extract_strided_slice %60 {offsets = [1, 0], sizes = [32, 16], strides = [1, 1]} : vector<34x16xf32> to vector<32x16xf32>
    %64 = vector.extract_strided_slice %58 {offsets = [16, 0], sizes = [16, 16], strides = [1, 1]} : vector<48x16xf32> to vector<16x16xf32>
    %cst_29 = arith.constant dense<0.000000e+00> : vector<32x16xf32>
    %65 = tpu.matmul %63, %64, %cst_29 {dimension_numbers = #tpu.dot_dimension_numbers<[1], [0], [0], [1], [0, 0, 1, 1], [], []>} : vector<32x16xf32>, vector<16x16xf32>, vector<32x16xf32> -> vector<32x16xf32>
    %66 = arith.addf %62, %65 : vector<32x16xf32>
    %67 = vector.extract_strided_slice %60 {offsets = [2, 0], sizes = [32, 16], strides = [1, 1]} : vector<34x16xf32> to vector<32x16xf32>
    %68 = vector.extract_strided_slice %58 {offsets = [32, 0], sizes = [16, 16], strides = [1, 1]} : vector<48x16xf32> to vector<16x16xf32>
    %cst_30 = arith.constant dense<0.000000e+00> : vector<32x16xf32>
    %69 = tpu.matmul %67, %68, %cst_30 {dimension_numbers = #tpu.dot_dimension_numbers<[1], [0], [0], [1], [0, 0, 1, 1], [], []>} : vector<32x16xf32>, vector<16x16xf32>, vector<32x16xf32> -> vector<32x16xf32>
    %70 = arith.addf %66, %69 : vector<32x16xf32>
    %c0_31 = arith.constant 0 : index
    %c0_32 = arith.constant 0 : index
    %71 = vector.load %arg8[%c0_31, %c0_32] : memref<1x16xf32, #tpu.memory_space<vmem>>, vector<1x16xf32>
    %72 = vector.broadcast %71 : vector<1x16xf32> to vector<32x16xf32>
    %73 = arith.addf %70, %72 : vector<32x16xf32>
    %cst_33 = arith.constant 0.000000e+00 : f32
    %74 = vector.broadcast %cst_33 : f32 to vector<32x16xf32>
    %75 = arith.maximumf %73, %74 : vector<32x16xf32>
    %c12_i32 = arith.constant 12 : i32
    %76 = vector.broadcast %c12_i32 : i32 to vector<32x1xi32>
    %77 = arith.cmpi slt, %8, %76 : vector<32x1xi32>
    %cst_34 = arith.constant 0.000000e+00 : f32
    %78 = vector.shape_cast %77 : vector<32x1xi1> to vector<32x1xi1>
    %79 = vector.broadcast %78 : vector<32x1xi1> to vector<32x16xi1>
    %80 = vector.broadcast %cst_34 : f32 to vector<32x16xf32>
    %81 = arith.select %79, %75, %80 : vector<32x16xi1>, vector<32x16xf32>
    %cst_35 = arith.constant dense<0.000000e+00> : vector<16xf32>
    %82 = vector.multi_reduction <add>, %81, %cst_35 [0] : vector<32x16xf32> to vector<16xf32>
    %83 = vector.shape_cast %82 : vector<16xf32> to vector<1x16xf32>
    %cst_36 = arith.constant 2.400000e+01 : f32
    %84 = vector.broadcast %cst_36 : f32 to vector<1x16xf32>
    %85 = arith.divf %83, %84 : vector<1x16xf32>
    %86 = arith.mulf %81, %81 : vector<32x16xf32>
    %cst_37 = arith.constant dense<0.000000e+00> : vector<16xf32>
    %87 = vector.multi_reduction <add>, %86, %cst_37 [0] : vector<32x16xf32> to vector<16xf32>
    %88 = vector.shape_cast %87 : vector<16xf32> to vector<1x16xf32>
    %cst_38 = arith.constant 2.400000e+01 : f32
    %89 = vector.broadcast %cst_38 : f32 to vector<1x16xf32>
    %90 = arith.divf %88, %89 : vector<1x16xf32>
    %91 = arith.mulf %85, %85 : vector<1x16xf32>
    %92 = arith.subf %90, %91 : vector<1x16xf32>
    %cst_39 = arith.constant 0.000000e+00 : f32
    %93 = vector.broadcast %cst_39 : f32 to vector<1x16xf32>
    %94 = arith.maximumf %92, %93 : vector<1x16xf32>
    %cst_40 = arith.constant 9.99999974E-6 : f32
    %95 = vector.broadcast %cst_40 : f32 to vector<1x16xf32>
    %96 = arith.addf %94, %95 : vector<1x16xf32>
    %97 = math.rsqrt %96 : vector<1x16xf32>
    %c0_41 = arith.constant 0 : index
    %c0_42 = arith.constant 0 : index
    %98 = vector.load %arg9[%c0_41, %c0_42] : memref<1x16xf32, #tpu.memory_space<vmem>>, vector<1x16xf32>
    %99 = arith.mulf %97, %98 : vector<1x16xf32>
    %c0_43 = arith.constant 0 : index
    %c0_44 = arith.constant 0 : index
    %100 = vector.load %arg10[%c0_43, %c0_44] : memref<1x16xf32, #tpu.memory_space<vmem>>, vector<1x16xf32>
    %101 = arith.mulf %85, %99 : vector<1x16xf32>
    %102 = arith.subf %100, %101 : vector<1x16xf32>
    %103 = vector.broadcast %99 : vector<1x16xf32> to vector<32x16xf32>
    %104 = arith.mulf %81, %103 : vector<32x16xf32>
    %105 = vector.broadcast %102 : vector<1x16xf32> to vector<32x16xf32>
    %106 = arith.addf %104, %105 : vector<32x16xf32>
    %c0_45 = arith.constant 0 : index
    %c0_46 = arith.constant 0 : index
    %107 = vector.load %arg11[%c0_45, %c0_46] : memref<48x32xf32, #tpu.memory_space<vmem>>, vector<48x32xf32>
    %cst_47 = arith.constant 0.000000e+00 : f32
    %108 = vector.broadcast %cst_47 : f32 to vector<2x16xf32>
    %109 = tpu.concatenate %106, %108 in 0 : vector<32x16xf32>, vector<2x16xf32> -> vector<34x16xf32>
    %110 = vector.extract_strided_slice %107 {offsets = [0, 0], sizes = [16, 32], strides = [1, 1]} : vector<48x32xf32> to vector<16x32xf32>
    %cst_48 = arith.constant dense<0.000000e+00> : vector<32x32xf32>
    %111 = tpu.matmul %106, %110, %cst_48 {dimension_numbers = #tpu.dot_dimension_numbers<[1], [0], [0], [1], [0, 0, 1, 1], [], []>} : vector<32x16xf32>, vector<16x32xf32>, vector<32x32xf32> -> vector<32x32xf32>
    %112 = vector.extract_strided_slice %109 {offsets = [1, 0], sizes = [32, 16], strides = [1, 1]} : vector<34x16xf32> to vector<32x16xf32>
    %113 = vector.extract_strided_slice %107 {offsets = [16, 0], sizes = [16, 32], strides = [1, 1]} : vector<48x32xf32> to vector<16x32xf32>
    %cst_49 = arith.constant dense<0.000000e+00> : vector<32x32xf32>
    %114 = tpu.matmul %112, %113, %cst_49 {dimension_numbers = #tpu.dot_dimension_numbers<[1], [0], [0], [1], [0, 0, 1, 1], [], []>} : vector<32x16xf32>, vector<16x32xf32>, vector<32x32xf32> -> vector<32x32xf32>
    %115 = arith.addf %111, %114 : vector<32x32xf32>
    %116 = vector.extract_strided_slice %109 {offsets = [2, 0], sizes = [32, 16], strides = [1, 1]} : vector<34x16xf32> to vector<32x16xf32>
    %117 = vector.extract_strided_slice %107 {offsets = [32, 0], sizes = [16, 32], strides = [1, 1]} : vector<48x32xf32> to vector<16x32xf32>
    %cst_50 = arith.constant dense<0.000000e+00> : vector<32x32xf32>
    %118 = tpu.matmul %116, %117, %cst_50 {dimension_numbers = #tpu.dot_dimension_numbers<[1], [0], [0], [1], [0, 0, 1, 1], [], []>} : vector<32x16xf32>, vector<16x32xf32>, vector<32x32xf32> -> vector<32x32xf32>
    %119 = arith.addf %115, %118 : vector<32x32xf32>
    %c0_51 = arith.constant 0 : index
    %c0_52 = arith.constant 0 : index
    %120 = vector.load %arg12[%c0_51, %c0_52] : memref<1x32xf32, #tpu.memory_space<vmem>>, vector<1x32xf32>
    %121 = vector.broadcast %120 : vector<1x32xf32> to vector<32x32xf32>
    %122 = arith.addf %119, %121 : vector<32x32xf32>
    %cst_53 = arith.constant 0.000000e+00 : f32
    %123 = vector.broadcast %cst_53 : f32 to vector<32x32xf32>
    %124 = arith.maximumf %122, %123 : vector<32x32xf32>
    %c10_i32 = arith.constant 10 : i32
    %125 = vector.broadcast %c10_i32 : i32 to vector<32x1xi32>
    %126 = arith.cmpi slt, %8, %125 : vector<32x1xi32>
    %cst_54 = arith.constant 0.000000e+00 : f32
    %127 = vector.shape_cast %126 : vector<32x1xi1> to vector<32x1xi1>
    %128 = vector.broadcast %127 : vector<32x1xi1> to vector<32x32xi1>
    %129 = vector.broadcast %cst_54 : f32 to vector<32x32xf32>
    %130 = arith.select %128, %124, %129 : vector<32x32xi1>, vector<32x32xf32>
    %cst_55 = arith.constant dense<0.000000e+00> : vector<32xf32>
    %131 = vector.multi_reduction <add>, %130, %cst_55 [0] : vector<32x32xf32> to vector<32xf32>
    %132 = vector.shape_cast %131 : vector<32xf32> to vector<1x32xf32>
    %cst_56 = arith.constant 2.000000e+01 : f32
    %133 = vector.broadcast %cst_56 : f32 to vector<1x32xf32>
    %134 = arith.divf %132, %133 : vector<1x32xf32>
    %135 = arith.mulf %130, %130 : vector<32x32xf32>
    %cst_57 = arith.constant dense<0.000000e+00> : vector<32xf32>
    %136 = vector.multi_reduction <add>, %135, %cst_57 [0] : vector<32x32xf32> to vector<32xf32>
    %137 = vector.shape_cast %136 : vector<32xf32> to vector<1x32xf32>
    %cst_58 = arith.constant 2.000000e+01 : f32
    %138 = vector.broadcast %cst_58 : f32 to vector<1x32xf32>
    %139 = arith.divf %137, %138 : vector<1x32xf32>
    %140 = arith.mulf %134, %134 : vector<1x32xf32>
    %141 = arith.subf %139, %140 : vector<1x32xf32>
    %cst_59 = arith.constant 0.000000e+00 : f32
    %142 = vector.broadcast %cst_59 : f32 to vector<1x32xf32>
    %143 = arith.maximumf %141, %142 : vector<1x32xf32>
    %cst_60 = arith.constant 9.99999974E-6 : f32
    %144 = vector.broadcast %cst_60 : f32 to vector<1x32xf32>
    %145 = arith.addf %143, %144 : vector<1x32xf32>
    %146 = math.rsqrt %145 : vector<1x32xf32>
    %c0_61 = arith.constant 0 : index
    %c0_62 = arith.constant 0 : index
    %147 = vector.load %arg13[%c0_61, %c0_62] : memref<1x32xf32, #tpu.memory_space<vmem>>, vector<1x32xf32>
    %148 = arith.mulf %146, %147 : vector<1x32xf32>
    %c0_63 = arith.constant 0 : index
    %c0_64 = arith.constant 0 : index
    %149 = vector.load %arg14[%c0_63, %c0_64] : memref<1x32xf32, #tpu.memory_space<vmem>>, vector<1x32xf32>
    %150 = arith.mulf %134, %148 : vector<1x32xf32>
    %151 = arith.subf %149, %150 : vector<1x32xf32>
    %152 = vector.broadcast %148 : vector<1x32xf32> to vector<32x32xf32>
    %153 = arith.mulf %130, %152 : vector<32x32xf32>
    %154 = vector.broadcast %151 : vector<1x32xf32> to vector<32x32xf32>
    %155 = arith.addf %153, %154 : vector<32x32xf32>
    %156 = vector.extract_strided_slice %155 {offsets = [0, 0], sizes = [10, 32], strides = [1, 1]} : vector<32x32xf32> to vector<10x32xf32>
    %c0_65 = arith.constant 0 : index
    %c0_66 = arith.constant 0 : index
    %c0_67 = arith.constant 0 : index
    %157 = vector.load %arg15[%c0_65, %c0_66, %c0_67] : memref<2x10x32xf32, #tpu.memory_space<vmem>>, vector<1x10x32xf32>
    %158 = vector.shape_cast %157 : vector<1x10x32xf32> to vector<10x32xf32>
    %159 = vector.shape_cast %156 : vector<10x32xf32> to vector<1x10x32xf32>
    tpu.vector_store %arg15[%c0_65, %c0_66, %c0_67], %159 {strides = array<i32>} : memref<2x10x32xf32, #tpu.memory_space<vmem>>, vector<1x10x32xf32>,
    %160 = vector.extract_strided_slice %155 {offsets = [16, 0], sizes = [10, 32], strides = [1, 1]} : vector<32x32xf32> to vector<10x32xf32>
    %c1 = arith.constant 1 : index
    %c0_68 = arith.constant 0 : index
    %c0_69 = arith.constant 0 : index
    %161 = vector.load %arg15[%c1, %c0_68, %c0_69] : memref<2x10x32xf32, #tpu.memory_space<vmem>>, vector<1x10x32xf32>
    %162 = vector.shape_cast %161 : vector<1x10x32xf32> to vector<10x32xf32>
    %163 = vector.shape_cast %160 : vector<10x32xf32> to vector<1x10x32xf32>
    tpu.vector_store %arg15[%c1, %c0_68, %c0_69], %163 {strides = array<i32>} : memref<2x10x32xf32, #tpu.memory_space<vmem>>, vector<1x10x32xf32>,
    return
  }
}

</mosaic_0001>

<bundles_post_ra>
// kernel: protein_cnn_forward.1
= control target key start
LH: loop header
LB: loop body
LE: loop exit
PB: predicated region body
PF: predicated region fallthrough
CT: control target
= control target key end

     0   :  { %v2423_v0 = vmov 0   ;;  %vm97_vm4 = vcmask 1041408   ;;  %v54_v54 = vlaneseq  ;;  %vm84_vm13 = vcmask 211968   ;;  %s2831_s0 = inlined_call_operand.vmem [shape: s32[32,1], index: 0, kind: input, shape index: {}]   ;;  %s2832_s1 = inlined_call_operand.vmem [shape: s32[32,1], index: 1, kind: input, shape index: {}]   ;;  %s2833_s2 = inlined_call_operand.vmem [shape: f32[26,8], index: 2, kind: input, shape index: {}]   ;;  %s2834_s3 = inlined_call_operand.vmem [shape: f32[24,16], index: 3, kind: input, shape index: {}]   ;;  %s2835_s7 = inlined_call_operand.vmem [shape: f32[48,16], index: 7, kind: input, shape index: {}]   ;;  %s2836_s4 = inlined_call_operand.vmem [shape: f32[1,16], index: 4, kind: input, shape index: {}]   ;;  %s2837_s5 = inlined_call_operand.vmem [shape: f32[1,16], index: 5, kind: input, shape index: {}]   ;;  %s2838_s6 = inlined_call_operand.vmem [shape: f32[1,16], index: 6, kind: input, shape index: {}]   ;;  %s2839_s11 = inlined_call_operand.vmem [shape: f32[48,32], index: 11, kind: input, shape index: {}]   ;;  %s2840_s8 = inlined_call_operand.vmem [shape: f32[1,16], index: 8, kind: input, shape index: {}]   ;;  %s2841_s9 = inlined_call_operand.vmem [shape: f32[1,16], index: 9, kind: input, shape index: {}]   ;;  %s2842_s10 = inlined_call_operand.vmem [shape: f32[1,16], index: 10, kind: input, shape index: {}]   ;;  %s2843_s12 = inlined_call_operand.vmem [shape: f32[1,32], index: 12, kind: input, shape index: {}]   ;;  %s2844_s13 = inlined_call_operand.vmem [shape: f32[1,32], index: 13, kind: input, shape index: {}]   ;;  %s2845_s14 = inlined_call_operand.vmem [shape: f32[1,32], index: 14, kind: input, shape index: {}]   ;;  %s2846_s15 = inlined_call_operand.vmem [shape: f32[2,10,32], index: 15, kind: output, shape index: {}]  }
   0x1   :  { %2416 = vset.pattern.permute.xlu1 %v2423_v0  ;;  %2415 = vset.pattern.permute.xlu0 %v2423_v0  ;;  %v52_v1 = vld [vmem:[%s2831_s0 + $0x10] sm:$0xff]  ;;  %v50_v2 = vld [vmem:[%s2831_s0] sm:$0xff]  ;;  %v2516_v3 = vld [vmem:[%s2832_s1 + $0x8] sm:$0xff]  ;;  %v2424_v58 = vmov 0.0  }
   0x2   :  { %63 = vperm.xlu1 %2416, %v52_v1   ;;  %57 = vperm.xlu0 %2415, %v50_v2   ;;  %v2521_v4 = vld [vmem:[%s2832_s1] sm:$0xff]  ;;  %v53_v5 = vld [vmem:[%s2831_s0 + $0x18] sm:$0xff]  ;;  %v51_v6 = vld [vmem:[%s2831_s0 + $0x8] sm:$0xff]  ;;  %vm1047_vm0 = vcmp.lt.s32.totalorder %v2516_v3, 14  ;;  %vm1461_vm5 = vcmp.lt.s32.totalorder %v2516_v3, 12  ;;  %vm1874_vm9 = vcmp.lt.s32.totalorder %v2516_v3, 10 }
   0x3   :  { %vm1046_vm1 = vcmp.lt.s32.totalorder %v2521_v4, 14  ;;  %v2534_v7 = vld [vmem:[%s2832_s1 + $0x18] sm:$0xff]  ;;  %v2539_v8 = vld [vmem:[%s2832_s1 + $0x10] sm:$0xff]  ;;  %v80_v9 = vld [vmem:[%s2833_s2] sm:$0xff]  ;;  %v1051_v11 = vsel %vm1047_vm0, 1, %v2423_v0  ;;  %vm1460_vm6 = vcmp.lt.s32.totalorder %v2521_v4, 12 }
   0x4   :  { %v81_v10 = vld [vmem:[%s2833_s2 + $0x8] sm:$0xff]  ;;  %v1050_v12 = vsel %vm1046_vm1, 1, %v2423_v0  ;;  %vm1049_vm2 = vcmp.lt.s32.totalorder %v2534_v7, 14  ;;  %v83_v13 = vld [vmem:[%s2833_s2 + $0x18] sm:$0x3]  ;;  %vm1048_vm3 = vcmp.lt.s32.totalorder %v2539_v8, 14 }
   0x5   :  { %v102_v14 = vand.u32 4294901760, %v80_v9  ;;  %v82_v15 = vld [vmem:[%s2833_s2 + $0x10] sm:$0xff]  ;;  %v105_v16 = vand.u32 4294901760, %v81_v10  ;;  %v1053_v17 = vsel %vm1049_vm2, 1, %v2423_v0  ;;  %v99_v18 = vsel %vm97_vm4, %v83_v13, 0 }
   0x6   :  { %66 = vperm.xlu1 %2416, %v53_v5   ;;  %60 = vperm.xlu0 %2415, %v51_v6   ;;  %v108_v19 = vand.u32 4294901760, %v82_v15  ;;  %v1052_v21 = vsel %vm1048_vm3, 1, %v2423_v0  ;;  %v111_v23 = vand.u32 4294901760, %v99_v18  ;;  %v1465_v32 = vsel %vm1461_vm5, 1, %v2423_v0 }
   0x7   :  { %v212_v20 = vsub.f32 %v80_v9, %v102_v14  ;;  %v2559_v22 = vpack.c.bf16 %v105_v16, %v102_v14  ;;  %v219_v24 = vsub.f32 %v81_v10, %v105_v16  ;;  %v1464_v33 = vsel %vm1460_vm6, 1, %v2423_v0 }
   0x8   :  { %v226_v26 = vsub.f32 %v82_v15, %v108_v19  ;;  %v2564_v27 = vpack.c.bf16 %v111_v23, %v108_v19  ;;  %v233_v29 = vsub.f32 %v99_v18, %v111_v23  ;;  %vm1463_vm7 = vcmp.lt.s32.totalorder %v2534_v7, 12  ;;  %v721_v23 = vld [vmem:[%s2834_s3 + $0x10] sm:$0xff] }
   0x9   :  { %v213_v25 = vand.u32 4294901760, %v212_v20  ;;  %2298 = vmatprep.subr.bf16.mxu0 %v2559_v22  ;;  %v220_v28 = vand.u32 4294901760, %v219_v24  ;;  %vm1462_vm8 = vcmp.lt.s32.totalorder %v2539_v8, 12  ;;  %v1467_v41 = vsel %vm1463_vm7, 1, %v2423_v0 }
   0xa   :  { %1058 = vperm.xlu1 %2416, %v1051_v11   ;;  %1055 = vperm.xlu0 %2415, %v1050_v12   ;;  %v227_v31 = vand.u32 4294901760, %v226_v26  ;;  %v234_v35 = vand.u32 4294901760, %v233_v29  ;;  %v1466_v42 = vsel %vm1462_vm8, 1, %v2423_v0  ;;  %vm1873_vm10 = vcmp.lt.s32.totalorder %v2521_v4, 10 }
   0xb   :  { %v214_v30 = vsub.f32 %v212_v20, %v213_v25  ;;  %2300 = vmatpush3.bf16.msra.mxu0 %v2559_v22  ;;  %v221_v34 = vsub.f32 %v219_v24, %v220_v28  ;;  %v2313_v46 = vpack.c.bf16 %v219_v24, %v212_v20  ;;  %v1878_v47 = vsel %vm1874_vm9, 1, %v2423_v0 }
   0xc   :  { %2302 = vmatprep.subr.bf16.mxu0 %v2564_v27  ;;  %v228_v37 = vsub.f32 %v226_v26, %v227_v31  ;;  %v235_v39 = vsub.f32 %v233_v29, %v234_v35  ;;  %v1877_v48 = vsel %vm1873_vm10, 1, %v2423_v0  ;;  %vm1876_vm11 = vcmp.lt.s32.totalorder %v2534_v7, 10 }
   0xd   :  { %v215_v36 = vand.u32 4294901760, %v214_v30  ;;  %v222_v38 = vand.u32 4294901760, %v221_v34  ;;  %vm1875_vm12 = vcmp.lt.s32.totalorder %v2539_v8, 10  ;;  %v2317_v49 = vpack.c.bf16 %v233_v29, %v226_v26 }
   0xe   :  { %1064 = vperm.xlu1 %2416, %v1053_v17   ;;  %1061 = vperm.xlu0 %2415, %v1052_v21   ;;  %v229_v40 = vand.u32 4294901760, %v228_v37  ;;  %v236_v44 = vand.u32 4294901760, %v235_v39  ;;  %v1880_v50 = vsel %vm1876_vm11, 1, %v2423_v0  ;;  %v1879_v51 = vsel %vm1875_vm12, 1, %v2423_v0  ;;  %v719_v21 = vld [vmem:[%s2834_s3] sm:$0xff] }
   0xf   :  { %2304 = vmatpush3.bf16.msra.mxu0 %v2564_v27  ;;  %v2305_v43 = vpack.c.bf16 %v222_v38, %v215_v36  ;;  %v2583_v52 = vpack.c.bf16 %v220_v28, %v213_v25  ;;  %v2585_v53 = vpack.c.bf16 %v234_v35, %v227_v31  ;;  %v55_v55 = vand.u32 127, %v54_v54  ;;  %2221 = vmatprep.subr.mxu1 %v719_v21 }
  0x10   :  { %v2309_v45 = vpack.c.bf16 %v236_v44, %v229_v40  ;;  %2222 = vmatpush3.msra.mxu1 %v719_v21  ;;  %vm737_vm2 = vcmask 64512   ;;  %vm727_vm3 = vcmask 1046528   ;;  %vm924_vm4 = vcmask 1045504  }
  0x11   :  { %2306 = vmatprep.subr.bf16.mxu0 %v2305_v43  ;;  %2229 = vmatprep.subr.mxu1 %v721_v23  ;;  %v2649_v38 = vrot.slane %v2424_v58, 1  ;;  %vm1074_vm5 = vcmask 130048  }
  0x12   :  { %1472 = vperm.xlu1 %2416, %v1465_v32   ;;  %1469 = vperm.xlu0 %2415, %v1464_v33  }
  0x16   :  { %1478 = vperm.xlu1 %2416, %v1467_v41   ;;  %1475 = vperm.xlu0 %2415, %v1466_v42  }
  0x1a   :  { %1885 = vperm.xlu1 %2416, %v1878_v47   ;;  %1882 = vperm.xlu0 %2415, %v1877_v48   ;;  %v1139_v47 = vld [vmem:[%s2835_s7 + $0x18] sm:$0xff] }
  0x1e   :  { %1891 = vperm.xlu1 %2416, %v1880_v50   ;;  %1888 = vperm.xlu0 %2415, %v1879_v51   ;;  %v1137_v50 = vld [vmem:[%s2835_s7 + $0x8] sm:$0xff] }
  0x81   :  { %v64_v56 = vpop.permute.xlu1 %63  ;;  %v58_v57 = vpop.permute.xlu0 %57 }
  0x82   :  { %vm70_vm14 = vcmp.eq.s32.totalorder %v55_v55, %v64_v56  ;;  %vm68_vm15 = vcmp.eq.s32.totalorder %v55_v55, %v58_v57  ;;  %v2001_v56 = vld [vmem:[%s2836_s4] ss:$0 sm:$0xff] }
  0x83   :  { %v2589_v59 = vsel %vm70_vm14, 1.0, %v2424_v58  ;;  %v2592_v60 = vsel %vm68_vm15, 1.0, %v2424_v58  ;;  %vm1901_vm14 = vcmask 261120  }
  0x84   :  { %v92_v61 = vsel %vm84_vm13, %v2589_v59, 0  ;;  %v86_v62 = vsel %vm84_vm13, %v2592_v60, 0 }
  0x85   :  { %v191_v63 = vsub.f32 %v92_v61, %v92_v61  ;;  %v67_v0 = vpop.permute.xlu1 %66  ;;  %v61_v1 = vpop.permute.xlu0 %60  ;;  %v171_v2 = vsub.f32 %v86_v62, %v86_v62 }
  0x86   :  { %vm71_vm0 = vcmp.eq.s32.totalorder %v55_v55, %v67_v0  ;;  %vm69_vm1 = vcmp.eq.s32.totalorder %v55_v55, %v61_v1 }
  0x87   :  { %v1976_v3 = vsel %vm71_vm0, 1.0, %v2424_v58  ;;  %v1974_v4 = vsel %vm69_vm1, 1.0, %v2424_v58  ;;  %v172_v5 = vand.u32 4294901760, %v171_v2  ;;  %v192_v8 = vand.u32 4294901760, %v191_v63 }
  0x88   :  { %v95_v6 = vsel %vm84_vm13, %v1976_v3, 0  ;;  %v89_v7 = vsel %vm84_vm13, %v1974_v4, 0 }
  0x89   :  { %v201_v9 = vsub.f32 %v95_v6, %v95_v6  ;;  %v181_v10 = vsub.f32 %v89_v7, %v89_v7  ;;  %v173_v11 = vsub.f32 %v171_v2, %v172_v5  ;;  %v193_v15 = vsub.f32 %v191_v63, %v192_v8  ;;  %v1059_v57 = vpop.permute.xlu1 %1058 }
  0x8a   :  { %vm1067_vm6 = vcmp.eq.s32.totalorder %v1059_v57, 1 }
  0x8b   :  { %v174_v12 = vand.u32 4294901760, %v173_v11  ;;  %v182_v13 = vand.u32 4294901760, %v181_v10  ;;  %v202_v14 = vand.u32 4294901760, %v201_v9  ;;  %v194_v19 = vand.u32 4294901760, %v193_v15 }
  0x8d   :  { %2137 = vmatprep.mubr.f32.mxu0 %v174_v12  ;;  %v183_v16 = vsub.f32 %v181_v10, %v182_v13  ;;  %v203_v18 = vsub.f32 %v201_v9, %v202_v14 }
  0x8f   :  { %v184_v17 = vand.u32 4294901760, %v183_v16  ;;  %v204_v20 = vand.u32 4294901760, %v203_v18 }
  0x91   :  { %2138 = vmatmul.mubr.f32.vlgmr.msra.gmra.mrb[0].mxu0 %v184_v17 }
  0x92   :  { %2308 = vmatpush3.bf16.msra.mxu0 %v2305_v43  ;;  %2140 = vmatprep.mubr.f32.mxu0 %v194_v19  ;;  %v2659_v43 = vrot.slane %v2424_v58, 2 }
  0x93   :  { %2310 = vmatprep.subr.bf16.mxu0 %v2309_v45 }
  0x95   :  { %2141 = vmatmul.mubr.f32.gmra.mrb[2].mxu0 %v204_v20 }
  0x96   :  { %2312 = vmatpush3.bf16.msra.mxu0 %v2309_v45  ;;  %2151 = vmatprep.mubr.msk.f32.mxu0 %vm84_vm13, %v2592_v60 }
  0x97   :  { %2314 = vmatprep.subr.bf16.mxu0 %v2313_v46 }
  0x99   :  { %2152 = vmatmul.mubr.msk.f32.vlgmr.msra.gmra.mrb[0].mxu0 %vm84_vm13, %v1974_v4 }
  0x9a   :  { %2316 = vmatpush3.bf16.msra.mxu0 %v2313_v46  ;;  %2154 = vmatprep.mubr.msk.f32.mxu0 %vm84_vm13, %v2589_v59  ;;  %v1138_v46 = vld [vmem:[%s2835_s7 + $0x10] sm:$0xff] }
  0x9b   :  { %2318 = vmatprep.subr.bf16.mxu0 %v2317_v49  ;;  %v2345_v48 = vpack.c.bf16 %v1139_v47, %v1138_v46 }
  0x9d   :  { %2155 = vmatmul.mubr.msk.f32.gmra.mrb[2].mxu0 %vm84_vm13, %v1976_v3 }
  0x9e   :  { %2320 = vmatpush3.bf16.msra.mxu0 %v2317_v49  ;;  %2165 = vmatprep.mubr.f32.mxu0 %v171_v2  ;;  %v1136_v49 = vld [vmem:[%s2835_s7] sm:$0xff] }
  0x9f   :  { %2322 = vmatprep.subr.bf16.mxu0 %v2559_v22  ;;  %v2681_v51 = vpack.c.bf16 %v1137_v50, %v1136_v49 }
  0xa1   :  { %2166 = vmatmul.mubr.f32.vlgmr.msra.gmra.mrb[0].mxu0 %v181_v10 }
  0xa2   :  { %2324 = vmatpush3.bf16.msra.mxu0 %v2559_v22  ;;  %2168 = vmatprep.mubr.f32.mxu0 %v191_v63 }
  0xa3   :  { %2326 = vmatprep.subr.bf16.mxu0 %v2564_v27 }
  0xa5   :  { %2169 = vmatmul.mubr.f32.gmra.mrb[2].mxu0 %v201_v9 }
  0xa6   :  { %2328 = vmatpush3.bf16.msra.mxu0 %v2564_v27  ;;  %2179 = vmatprep.mubr.f32.mxu0 %v172_v5 }
  0xa7   :  { %2330 = vmatprep.subr.bf16.mxu0 %v2583_v52 }
  0xa9   :  { %2180 = vmatmul.mubr.f32.vlgmr.msra.gmra.mrb[0].mxu0 %v182_v13 }
  0xaa   :  { %2332 = vmatpush3.bf16.msra.mxu0 %v2583_v52  ;;  %2182 = vmatprep.mubr.f32.mxu0 %v192_v8  ;;  %v1065_v8 = vpop.permute.xlu1 %1064 }
  0xab   :  { %2334 = vmatprep.subr.bf16.mxu0 %v2585_v53  ;;  %vm1069_vm8 = vcmp.eq.s32.totalorder %v1065_v8, 1 }
  0xad   :  { %2183 = vmatmul.mubr.f32.gmra.mrb[2].mxu0 %v202_v14 }
  0xae   :  { %2336 = vmatpush3.bf16.msra.mxu0 %v2585_v53  ;;  %2193 = vmatprep.mubr.msk.f32.mxu0 %vm84_vm13, %v2592_v60 }
  0xaf   :  { %2338 = vmatprep.subr.bf16.mxu0 %v2559_v22 }
  0xb1   :  { %2194 = vmatmul.mubr.msk.f32.vlgmr.msra.gmra.mrb[0].mxu0 %vm84_vm13, %v1974_v4 }
  0xb2   :  { %2340 = vmatpush3.bf16.msra.mxu0 %v2559_v22  ;;  %2196 = vmatprep.mubr.msk.f32.mxu0 %vm84_vm13, %v2589_v59  ;;  %v720_v22 = vld [vmem:[%s2834_s3 + $0x8] sm:$0xff] }
  0xb3   :  { %2342 = vmatprep.subr.bf16.mxu0 %v2564_v27 }
  0xb5   :  { %2197 = vmatmul.mubr.msk.f32.gmra.mrb[2].mxu0 %vm84_vm13, %v1976_v3 }
  0xb6   :  { %2344 = vmatpush3.bf16.msra.mxu0 %v2564_v27  ;;  %2207 = vmatprep.mubr.msk.f32.mxu0 %vm84_vm13, %v2592_v60  ;;  %v1056_v60 = vpop.permute.xlu0 %1055 }
  0xb7   :  { %2213 = vmatprep.subr.mxu0 %v720_v22  ;;  %vm1066_vm7 = vcmp.eq.s32.totalorder %v1056_v60, 1 }
  0xb9   :  { %2208 = vmatmul.mubr.msk.f32.vlgmr.msra.gmra.mrb[0].mxu0 %vm84_vm13, %v1974_v4 }
  0xba   :  { %2210 = vmatprep.mubr.msk.f32.mxu0 %vm84_vm13, %v2589_v59  ;;  %2214 = vmatpush3.msra.mxu0 %v720_v22  ;;  %v1062_v11 = vpop.permute.xlu0 %1061 }
  0xbb   :  { %vm1068_vm9 = vcmp.eq.s32.totalorder %v1062_v11, 1 }
  0xbd   :  { %2211 = vmatmul.mubr.msk.f32.gmra.mrb[2].mxu0 %vm84_vm13, %v1976_v3 }
 0x18c   :  { %v2209_v24 = vpop.f32.mrb[0].mxu0 }
 0x18d   :  { %v729_v25 = vrot.slane %v2209_v24, 1  ;;  %v926_v26 = vrot.slane %v2209_v24, 2  ;;  %v693_v27 = vpop.f32.mrb[1].mxu0 }
 0x18e   :  { %v728_v28 = vrot.slane %v693_v27, 1  ;;  %v925_v29 = vrot.slane %v693_v27, 2  ;;  %2223 = vmatprep.mubr.msk.f32.mxu1 %vm737_vm2, %v693_v27 }
 0x18f   :  { %2224 = vmatmul.mubr.msk.f32.vlgmr.msra.gmra.mrb[0].mxu1 %vm737_vm2, %v2209_v24 }
 0x190   :  { %2230 = vmatpush3.msra.mxu1 %v721_v23  ;;  %v2212_v30 = vpop.f32.mrb[2].mxu0  ;;  %v730_v31 = vsel %vm727_vm3, %v728_v28, %v729_v25  ;;  %v927_v32 = vsel %vm924_vm4, %v925_v29, %v926_v26 }
 0x191   :  { %v733_v33 = vrot.slane %v2212_v30, 1  ;;  %v930_v34 = vrot.slane %v2212_v30, 2  ;;  %v705_v35 = vpop.f32.mrb[3].mxu0  ;;  %2215 = vmatprep.mubr.msk.f32.mxu0 %vm737_vm2, %v730_v31  ;;  %2346 = vmatprep.subr.bf16.mxu1 %v2345_v48 }
 0x192   :  { %v731_v36 = vrot.slane %v705_v35, 1  ;;  %v928_v37 = vrot.slane %v705_v35, 2  ;;  %2226 = vmatprep.mubr.msk.f32.mxu1 %vm737_vm2, %v705_v35 }
 0x193   :  { %2227 = vmatmul.mubr.msk.f32.gmra.mrb[2].mxu1 %vm737_vm2, %v2212_v30  ;;  %v736_v44 = vsel %vm727_vm3, %v733_v33, %v2649_v38  ;;  %v933_v45 = vsel %vm924_vm4, %v930_v34, %v2659_v43 }
 0x194   :  { %v732_v39 = vsel %vm727_vm3, %v729_v25, %v731_v36  ;;  %v929_v40 = vsel %vm924_vm4, %v926_v26, %v928_v37  ;;  %2231 = vmatprep.mubr.msk.f32.mxu1 %vm737_vm2, %v927_v32  ;;  %v734_v41 = vsel %vm727_vm3, %v731_v36, %v733_v33  ;;  %v931_v42 = vsel %vm924_vm4, %v928_v37, %v930_v34 }
 0x195   :  { %2216 = vmatmul.mubr.msk.f32.vlgmr.msra.gmra.mrb[4].mxu0 %vm737_vm2, %v732_v39 }
 0x196   :  { %2218 = vmatprep.mubr.msk.f32.mxu0 %vm737_vm2, %v734_v41 }
 0x197   :  { %2232 = vmatmul.mubr.msk.f32.vlgmr.msra.gmra.mrb[0].mxu1 %vm737_vm2, %v929_v40 }
 0x198   :  { %2234 = vmatprep.mubr.msk.f32.mxu1 %vm737_vm2, %v931_v42  ;;  %2348 = vmatpush3.bf16.msra.mxu1 %v2345_v48 }
 0x199   :  { %2219 = vmatmul.mubr.msk.f32.gmra.mrb[6].mxu0 %vm737_vm2, %v736_v44  ;;  %2350 = vmatprep.subr.bf16.mxu1 %v2681_v51 }
 0x19b   :  { %2235 = vmatmul.mubr.msk.f32.gmra.mrb[2].mxu1 %vm737_vm2, %v933_v45 }
 0x268   :  { %v2217_v52 = vpop.f32.mrb[4].mxu0 }
 0x269   :  { %v812_v53 = vpop.f32.mrb[5].mxu0 }
 0x26a   :  { %v2233_v55 = vpop.f32.mrb[0].mxu1 }
 0x26b   :  { %v2369_v58 = vadd.f32 %v2233_v55, %v2217_v52  ;;  %v1008_v59 = vpop.f32.mrb[1].mxu1 }
 0x26c   :  { %v2370_v61 = vadd.f32 %v1008_v59, %v812_v53  ;;  %v2220_v62 = vpop.f32.mrb[6].mxu0  ;;  %v1113_v59 = vld [vmem:[%s2837_s5] sm:$0x1] }
 0x26d   :  { %v1039_v63 = vadd.f32 %v2369_v58, %v2001_v56  ;;  %v822_v0 = vpop.f32.mrb[7].mxu0  ;;  %v1119_v58 = vshrl.u32 %v54_v54, 7 }
 0x26e   :  { %v1038_v1 = vadd.f32 %v2370_v61, %v2001_v56  ;;  %v2236_v2 = vpop.f32.mrb[2].mxu1 }
 0x26f   :  { %v1043_v3 = vmax.f32 %v1039_v63, 0.0  ;;  %v2371_v4 = vadd.f32 %v2236_v2, %v2220_v62  ;;  %v1018_v5 = vpop.f32.mrb[3].mxu1  ;;  %v2699_v60 = vsub.s32 0, %v1119_v58  ;;  %v1115_v63 = vld [vmem:[%s2838_s6] sm:$0x1] }
 0x270   :  { %v1042_v6 = vmax.f32 %v1038_v1, 0.0  ;;  %v2372_v7 = vadd.f32 %v1018_v5, %v822_v0 }
 0x271   :  { %v1071_v9 = vsel %vm1067_vm6, %v1043_v3, 0.0  ;;  %v1041_v10 = vadd.f32 %v2371_v4, %v2001_v56 }
 0x272   :  { %v1076_v12 = vsel %vm1074_vm5, %v1071_v9, 0.0  ;;  %v1091_v13 = vmul.f32 %v1071_v9, %v1071_v9  ;;  %v1070_v14 = vsel %vm1066_vm7, %v1042_v6, 0.0  ;;  %v1040_v15 = vadd.f32 %v2372_v7, %v2001_v56 }
 0x273   :  { %v1075_v16 = vsel %vm1074_vm5, %v1070_v14, 0.0  ;;  %v1090_v17 = vmul.f32 %v1070_v14, %v1070_v14  ;;  %v1045_v18 = vmax.f32 %v1041_v10, 0.0 }
 0x274   :  { %v1095_v19 = vsel %vm1074_vm5, %v1091_v13, 0.0  ;;  %v1077_v20 = vadd.f32 %v1076_v12, %v1075_v16  ;;  %v1044_v21 = vmax.f32 %v1040_v15, 0.0  ;;  %v1140_v12 = vld [vmem:[%s2835_s7 + $0x20] sm:$0xff]  ;;  %v1141_v13 = vld [vmem:[%s2835_s7 + $0x28] sm:$0xff] }
 0x275   :  { %v1094_v22 = vsel %vm1074_vm5, %v1090_v17, 0.0  ;;  %v1073_v23 = vsel %vm1069_vm8, %v1045_v18, 0.0 }
 0x276   :  { %v1096_v24 = vadd.f32 %v1095_v19, %v1094_v22  ;;  %v1072_v25 = vsel %vm1068_vm9, %v1044_v21, 0.0  ;;  %v1093_v26 = vmul.f32 %v1073_v23, %v1073_v23  ;;  %v1080_v30 = vsel %vm1074_vm5, %v1073_v23, 0.0 }
 0x277   :  { %v1078_v27 = vsel %vm1074_vm5, %v1072_v25, 0.0  ;;  %v1092_v28 = vmul.f32 %v1072_v25, %v1072_v25 }
 0x278   :  { %v1079_v29 = vadd.f32 %v1078_v27, %v1077_v20  ;;  %v1099_v34 = vsel %vm1074_vm5, %v1093_v26, 0.0 }
 0x279   :  { %v1097_v31 = vsel %vm1074_vm5, %v1092_v28, 0.0 }
 0x27a   :  { %v1081_v32 = vadd.f32 %v1080_v30, %v1079_v29  ;;  %v1098_v33 = vadd.f32 %v1097_v31, %v1096_v24  ;;  %v2353_v24 = vpack.c.bf16 %v1141_v13, %v1140_v12  ;;  %v1551_v29 = vld [vmem:[%s2839_s11 + $0x10] sm:$0xff]  ;;  %v1552_v30 = vld [vmem:[%s2839_s11 + $0x18] sm:$0xff] }
 0x27b   :  { %v2357_v31 = vpack.c.bf16 %v1552_v30, %v1551_v29 }
 0x27c   :  { %v1082_v35 = vrot.slane %v1081_v32, 4  ;;  %v1100_v36 = vadd.f32 %v1099_v34, %v1098_v33  ;;  %v1550_v33 = vld [vmem:[%s2839_s11 + $0x8] sm:$0xff] }
 0x27e   :  { %v1083_v37 = vadd.f32 %v1082_v35, %v1081_v32  ;;  %v1101_v39 = vrot.slane %v1100_v36, 4  ;;  %v1549_v32 = vld [vmem:[%s2839_s11] sm:$0xff] }
 0x27f   :  { %v2747_v34 = vpack.c.bf16 %v1550_v33, %v1549_v32  ;;  %v2014_v35 = vld [vmem:[%s2840_s8] ss:$0 sm:$0xff] }
 0x280   :  { %v1084_v40 = vrot.slane %v1083_v37, 2  ;;  %v1102_v41 = vadd.f32 %v1101_v39, %v1100_v36  ;;  %v1473_v36 = vpop.permute.xlu1 %1472 }
 0x281   :  { %vm1481_vm10 = vcmp.eq.s32.totalorder %v1473_v36, 1 }
 0x282   :  { %v1085_v42 = vadd.f32 %v1084_v40, %v1083_v37  ;;  %v1103_v44 = vrot.slane %v1102_v41, 2  ;;  %v1470_v37 = vpop.permute.xlu0 %1469 }
 0x283   :  { %vm1480_vm11 = vcmp.eq.s32.totalorder %v1470_v37, 1 }
 0x284   :  { %v1086_v45 = vrot.slane %v1085_v42, 1  ;;  %v1104_v46 = vadd.f32 %v1103_v44, %v1102_v41 }
 0x286   :  { %v1087_v47 = vadd.f32 %v1086_v45, %v1085_v42  ;;  %v1105_v48 = vrot.slane %v1104_v46, 1 }
 0x288   :  { %v1089_v49 = vmul.f32 0.035714287, %v1087_v47  ;;  %v1106_v50 = vadd.f32 %v1105_v48, %v1104_v46  ;;  %v1479_v47 = vpop.permute.xlu1 %1478 }
 0x289   :  { %vm1483_vm12 = vcmp.eq.s32.totalorder %v1479_v47, 1 }
 0x28a   :  { %v1107_v52 = vmul.f32 0.035714287, %v1106_v50  ;;  %v1108_v53 = vmul.f32 %v1089_v49, %v1089_v49 }
 0x28c   :  { %v1109_v55 = vsub.f32 %v1107_v52, %v1108_v53  ;;  %v1476_v52 = vpop.permute.xlu0 %1475 }
 0x28d   :  { %vm1482_vm13 = vcmp.eq.s32.totalorder %v1476_v52, 1  ;;  %v1553_v52 = vld [vmem:[%s2839_s11 + $0x20] sm:$0xff] }
 0x28e   :  { %v1110_v56 = vmax.f32 %v1109_v55, 0.0 }
 0x290   :  { %v1111_v57 = vadd.f32 1e-05, %v1110_v56 }
 0x292   :  { %2417 = vrsqrt.f32 %v1111_v57 }
 0x29c   :  { %v2418_v61 = vpop.eup %2417 }
 0x29d   :  { %v1114_v62 = vmul.f32 %v2418_v61, %v1113_v59 }
 0x29f   :  { %v1116_v0 = vmul.f32 %v1114_v62, %v1089_v49  ;;  %v1121_v1 = vrot.slane %v1114_v62, %v2699_v60 }
 0x2a1   :  { %v1117_v2 = vsub.f32 %v1115_v63, %v1116_v0  ;;  %v1124_v3 = vmul.f32 %v1121_v1, %v1072_v25  ;;  %v1122_v4 = vmul.f32 %v1121_v1, %v1070_v14  ;;  %v1123_v5 = vmul.f32 %v1121_v1, %v1071_v9 }
 0x2a2   :  { %v1125_v54 = vmul.f32 %v1121_v1, %v1073_v23 }
 0x2a3   :  { %v1130_v6 = vrot.slane %v1117_v2, %v2699_v60 }
 0x2a5   :  { %v1134_v7 = vadd.f32 %v1130_v6, %v1124_v3  ;;  %v1132_v8 = vadd.f32 %v1130_v6, %v1122_v4  ;;  %v1133_v10 = vadd.f32 %v1130_v6, %v1123_v5  ;;  %v1135_v11 = vadd.f32 %v1130_v6, %v1125_v54 }
 0x2a7   :  { %v1146_v15 = vrot.slane %v1132_v8, 1  ;;  %v1147_v16 = vrot.slane %v1133_v10, 1  ;;  %v1149_v17 = vrot.slane %v1134_v7, 1  ;;  %v1151_v14 = vrot.slane %v1135_v11, 1 }
 0x2a8   :  { %v1340_v9 = vrot.slane %v1132_v8, 2  ;;  %v1341_v18 = vrot.slane %v1133_v10, 2  ;;  %v1343_v19 = vrot.slane %v1134_v7, 2  ;;  %v1345_v20 = vrot.slane %v1135_v11, 2 }
 0x2a9   :  { %v1148_v21 = vsel %vm727_vm3, %v1146_v15, %v1147_v16  ;;  %v1150_v22 = vsel %vm727_vm3, %v1147_v16, %v1149_v17  ;;  %v1152_v23 = vsel %vm727_vm3, %v1149_v17, %v1151_v14  ;;  %v1153_v28 = vsel %vm727_vm3, %v1151_v14, %v2649_v38 }
 0x2aa   :  { %2241 = vmatprep.mubr.msk.f32.mxu1 %vm1074_vm5, %v1148_v21  ;;  %v1342_v25 = vsel %vm924_vm4, %v1340_v9, %v1341_v18  ;;  %v1344_v26 = vsel %vm924_vm4, %v1341_v18, %v1343_v19  ;;  %v1346_v27 = vsel %vm924_vm4, %v1343_v19, %v1345_v20 }
 0x2ab   :  { %2242 = vmatmul.mubr.msk.f32.vlgmr.msra.gmra.mrb[4].mxu1 %vm1074_vm5, %v1150_v22 }
 0x2ac   :  { %2352 = vmatpush3.bf16.msra.mxu1 %v2681_v51  ;;  %2244 = vmatprep.mubr.msk.f32.mxu1 %vm1074_vm5, %v1152_v23  ;;  %v1347_v51 = vsel %vm924_vm4, %v1345_v20, %v2659_v43 }
 0x2ad   :  { %2354 = vmatprep.subr.bf16.mxu1 %v2353_v24 }
 0x2af   :  { %2245 = vmatmul.mubr.msk.f32.gmra.mrb[6].mxu1 %vm1074_vm5, %v1153_v28 }
 0x2b0   :  { %2251 = vmatprep.mubr.msk.f32.mxu1 %vm1074_vm5, %v1132_v8 }
 0x2b3   :  { %2252 = vmatmul.mubr.msk.f32.vlgmr.msra.gmra.mrb[4].mxu1 %vm1074_vm5, %v1133_v10 }
 0x2b4   :  { %2356 = vmatpush3.bf16.msra.mxu1 %v2353_v24  ;;  %2254 = vmatprep.mubr.msk.f32.mxu1 %vm1074_vm5, %v1134_v7 }
 0x2b5   :  { %2358 = vmatprep.subr.bf16.mxu1 %v2357_v31 }
 0x2b7   :  { %2255 = vmatmul.mubr.msk.f32.gmra.mrb[6].mxu1 %vm1074_vm5, %v1135_v11 }
 0x2b8   :  { %2261 = vmatprep.mubr.msk.f32.mxu1 %vm1074_vm5, %v1342_v25 }
 0x2bb   :  { %2262 = vmatmul.mubr.msk.f32.vlgmr.msra.gmra.mrb[4].mxu1 %vm1074_vm5, %v1344_v26 }
 0x2bc   :  { %2264 = vmatprep.mubr.msk.f32.mxu1 %vm1074_vm5, %v1346_v27  ;;  %2360 = vmatpush3.bf16.msra.mxu1 %v2357_v31  ;;  %v1526_v31 = vld [vmem:[%s2841_s9] sm:$0x1] }
 0x2bd   :  { %2362 = vmatprep.subr.bf16.mxu1 %v2747_v34 }
 0x2bf   :  { %2265 = vmatmul.mubr.msk.f32.gmra.mrb[6].mxu1 %vm1074_vm5, %v1347_v51 }
 0x38e   :  { %v2263_v39 = vpop.f32.mrb[4].mxu1 }
 0x38f   :  { %v1453_v40 = vadd.f32 %v2263_v39, %v2014_v35  ;;  %v1422_v41 = vpop.f32.mrb[5].mxu1 }
 0x390   :  { %v1452_v42 = vadd.f32 %v2014_v35, %v1422_v41 }
 0x391   :  { %v1457_v44 = vmax.f32 %v1453_v40, 0.0 }
 0x392   :  { %v1456_v45 = vmax.f32 %v1452_v42, 0.0  ;;  %v2266_v46 = vpop.f32.mrb[6].mxu1 }
 0x393   :  { %v1485_v48 = vsel %vm1481_vm10, %v1457_v44, 0.0  ;;  %v1455_v49 = vadd.f32 %v2266_v46, %v2014_v35  ;;  %v1432_v50 = vpop.f32.mrb[7].mxu1 }
 0x394   :  { %v1489_v53 = vsel %vm1074_vm5, %v1485_v48, 0.0  ;;  %v1504_v55 = vmul.f32 %v1485_v48, %v1485_v48  ;;  %v1484_v56 = vsel %vm1480_vm11, %v1456_v45, 0.0  ;;  %v1454_v57 = vadd.f32 %v2014_v35, %v1432_v50  ;;  %v1528_v35 = vld [vmem:[%s2842_s10] sm:$0x1] }
 0x395   :  { %v1488_v58 = vsel %vm1074_vm5, %v1484_v56, 0.0  ;;  %v1503_v59 = vmul.f32 %v1484_v56, %v1484_v56  ;;  %v1459_v61 = vmax.f32 %v1455_v49, 0.0 }
 0x396   :  { %v1508_v62 = vsel %vm1074_vm5, %v1504_v55, 0.0  ;;  %v1490_v63 = vadd.f32 %v1489_v53, %v1488_v58  ;;  %v1458_v0 = vmax.f32 %v1454_v57, 0.0  ;;  %v1554_v53 = vld [vmem:[%s2839_s11 + $0x28] sm:$0xff] }
 0x397   :  { %v1507_v1 = vsel %vm1074_vm5, %v1503_v59, 0.0  ;;  %v1487_v2 = vsel %vm1483_vm12, %v1459_v61, 0.0 }
 0x398   :  { %v1509_v3 = vadd.f32 %v1508_v62, %v1507_v1  ;;  %v1486_v4 = vsel %vm1482_vm13, %v1458_v0, 0.0  ;;  %v1506_v5 = vmul.f32 %v1487_v2, %v1487_v2  ;;  %v1493_v8 = vsel %vm1074_vm5, %v1487_v2, 0.0 }
 0x399   :  { %v1491_v54 = vsel %vm1074_vm5, %v1486_v4, 0.0  ;;  %v1505_v6 = vmul.f32 %v1486_v4, %v1486_v4  ;;  %v2365_v1 = vpack.c.bf16 %v1554_v53, %v1553_v52 }
 0x39a   :  { %v1492_v7 = vadd.f32 %v1491_v54, %v1490_v63  ;;  %v1512_v13 = vsel %vm1074_vm5, %v1506_v5, 0.0 }
 0x39b   :  { %v1510_v10 = vsel %vm1074_vm5, %v1505_v6, 0.0  ;;  %v1886_v6 = vpop.permute.xlu1 %1885 }
 0x39c   :  { %v1494_v11 = vadd.f32 %v1493_v8, %v1492_v7  ;;  %v1511_v12 = vadd.f32 %v1510_v10, %v1509_v3  ;;  %v1883_v7 = vpop.permute.xlu0 %1882  ;;  %vm1894_vm15 = vcmp.eq.s32.totalorder %v1886_v6, 1 }
 0x39d   :  { %vm1893_vm0 = vcmp.eq.s32.totalorder %v1883_v7, 1 }
 0x39e   :  { %v1495_v15 = vrot.slane %v1494_v11, 4  ;;  %v1513_v16 = vadd.f32 %v1512_v13, %v1511_v12 }
 0x3a0   :  { %v1496_v17 = vadd.f32 %v1495_v15, %v1494_v11  ;;  %v1514_v14 = vrot.slane %v1513_v16, 4 }
 0x3a2   :  { %v1497_v9 = vrot.slane %v1496_v17, 2  ;;  %v1515_v18 = vadd.f32 %v1514_v14, %v1513_v16 }
 0x3a4   :  { %v1498_v19 = vadd.f32 %v1497_v9, %v1496_v17  ;;  %v1516_v20 = vrot.slane %v1515_v18, 2  ;;  %v1892_v17 = vpop.permute.xlu1 %1891 }
 0x3a5   :  { %vm1896_vm1 = vcmp.eq.s32.totalorder %v1892_v17, 1 }
 0x3a6   :  { %v1499_v21 = vrot.slane %v1498_v19, 1  ;;  %v1517_v22 = vadd.f32 %v1516_v20, %v1515_v18  ;;  %v1889_v18 = vpop.permute.xlu0 %1888 }
 0x3a7   :  { %vm1895_vm2 = vcmp.eq.s32.totalorder %v1889_v18, 1 }
 0x3a8   :  { %v1500_v23 = vadd.f32 %v1499_v21, %v1498_v19  ;;  %v1518_v24 = vrot.slane %v1517_v22, 1 }
 0x3aa   :  { %v1502_v25 = vmul.f32 0.041666668, %v1500_v23  ;;  %v1519_v26 = vadd.f32 %v1518_v24, %v1517_v22 }
 0x3ac   :  { %v1520_v27 = vmul.f32 0.041666668, %v1519_v26  ;;  %v1521_v28 = vmul.f32 %v1502_v25, %v1502_v25 }
 0x3ae   :  { %v1522_v51 = vsub.f32 %v1520_v27, %v1521_v28 }
 0x3b0   :  { %v1523_v29 = vmax.f32 %v1522_v51, 0.0 }
 0x3b2   :  { %v1524_v30 = vadd.f32 1e-05, %v1523_v29 }
 0x3b4   :  { %2419 = vrsqrt.f32 %v1524_v30 }
 0x3be   :  { %v2420_v32 = vpop.eup %2419 }
 0x3bf   :  { %v1527_v33 = vmul.f32 %v2420_v32, %v1526_v31 }
 0x3c1   :  { %v1529_v36 = vmul.f32 %v1527_v33, %v1502_v25  ;;  %v1534_v37 = vrot.slane %v1527_v33, %v2699_v60 }
 0x3c3   :  { %v1530_v39 = vsub.f32 %v1528_v35, %v1529_v36  ;;  %v1537_v40 = vmul.f32 %v1534_v37, %v1486_v4  ;;  %v1535_v41 = vmul.f32 %v1534_v37, %v1484_v56  ;;  %v1536_v42 = vmul.f32 %v1534_v37, %v1485_v48 }
 0x3c4   :  { %v1538_v44 = vmul.f32 %v1534_v37, %v1487_v2 }
 0x3c5   :  { %v1543_v45 = vrot.slane %v1530_v39, %v2699_v60 }
 0x3c7   :  { %v1547_v46 = vadd.f32 %v1543_v45, %v1537_v40  ;;  %v1545_v47 = vadd.f32 %v1543_v45, %v1535_v41  ;;  %v1546_v49 = vadd.f32 %v1543_v45, %v1536_v42  ;;  %v1548_v50 = vadd.f32 %v1543_v45, %v1538_v44 }
 0x3c9   :  { %v1562_v55 = vrot.slane %v1547_v46, 1  ;;  %v1756_v57 = vrot.slane %v1547_v46, 2  ;;  %v1559_v58 = vrot.slane %v1545_v47, 1  ;;  %v1560_v56 = vrot.slane %v1546_v49, 1 }
 0x3ca   :  { %v1564_v48 = vrot.slane %v1548_v50, 1  ;;  %v1753_v59 = vrot.slane %v1545_v47, 2  ;;  %v1754_v61 = vrot.slane %v1546_v49, 2  ;;  %v1758_v62 = vrot.slane %v1548_v50, 2 }
 0x3cb   :  { %v1561_v63 = vsel %vm727_vm3, %v1559_v58, %v1560_v56  ;;  %v1563_v0 = vsel %vm727_vm3, %v1560_v56, %v1562_v55 }
 0x3cc   :  { %2271 = vmatprep.mubr.msk.f32.mxu1 %vm1074_vm5, %v1561_v63  ;;  %v1565_v2 = vsel %vm727_vm3, %v1562_v55, %v1564_v48  ;;  %v1755_v3 = vsel %vm924_vm4, %v1753_v59, %v1754_v61  ;;  %v1757_v4 = vsel %vm924_vm4, %v1754_v61, %v1756_v57  ;;  %v1759_v5 = vsel %vm924_vm4, %v1756_v57, %v1758_v62 }
 0x3cd   :  { %2272 = vmatmul.mubr.msk.f32.vlgmr.msra.gmra.mrb[8].mxu1 %vm1074_vm5, %v1563_v0  ;;  %v1566_v54 = vsel %vm727_vm3, %v1564_v48, %v2649_v38  ;;  %v1760_v38 = vsel %vm924_vm4, %v1758_v62, %v2659_v43  ;;  %vm1964_vm3 = vcmask 254976  }
 0x3ce   :  { %2364 = vmatpush3.bf16.msra.mxu1 %v2747_v34  ;;  %2274 = vmatprep.mubr.msk.f32.mxu1 %vm1074_vm5, %v1565_v2  ;;  %v2027_v34 = vld [vmem:[%s2843_s12] ss:$0 sm:$0xff] }
 0x3cf   :  { %2366 = vmatprep.subr.bf16.mxu1 %v2365_v1  ;;  %v1940_v2 = vld [vmem:[%s2844_s13] sm:$0x1] }
 0x3d1   :  { %2275 = vmatmul.mubr.msk.f32.gmra.mrb[10].mxu1 %vm1074_vm5, %v1566_v54 }
 0x3d2   :  { %2281 = vmatprep.mubr.msk.f32.mxu1 %vm1074_vm5, %v1545_v47 }
 0x3d5   :  { %2282 = vmatmul.mubr.msk.f32.vlgmr.msra.gmra.mrb[8].mxu1 %vm1074_vm5, %v1546_v49 }
 0x3d6   :  { %2368 = vmatpush3.bf16.msra.mxu1 %v2365_v1  ;;  %2284 = vmatprep.mubr.msk.f32.mxu1 %vm1074_vm5, %v1547_v46 }
 0x3d9   :  { %2285 = vmatmul.mubr.msk.f32.gmra.mrb[10].mxu1 %vm1074_vm5, %v1548_v50 }
 0x3da   :  { %2291 = vmatprep.mubr.msk.f32.mxu1 %vm1074_vm5, %v1755_v3 }
 0x3dd   :  { %2292 = vmatmul.mubr.msk.f32.vlgmr.msra.gmra.mrb[8].mxu1 %vm1074_vm5, %v1757_v4 }
 0x3de   :  { %2294 = vmatprep.mubr.msk.f32.mxu1 %vm1074_vm5, %v1759_v5  ;;  %v1942_v5 = vld [vmem:[%s2845_s14] sm:$0x1] }
 0x3e1   :  { %2295 = vmatmul.mubr.msk.f32.gmra.mrb[10].mxu1 %vm1074_vm5, %v1760_v38 }
 0x4b0   :  { %v2293_v8 = vpop.f32.mrb[8].mxu1 }
 0x4b1   :  { %v1866_v10 = vadd.f32 %v2293_v8, %v2027_v34  ;;  %v1835_v11 = vpop.f32.mrb[9].mxu1 }
 0x4b2   :  { %v1865_v12 = vadd.f32 %v2027_v34, %v1835_v11 }
 0x4b3   :  { %v1870_v13 = vmax.f32 %v1866_v10, 0.0 }
 0x4b4   :  { %v1869_v15 = vmax.f32 %v1865_v12, 0.0  ;;  %v2296_v16 = vpop.f32.mrb[10].mxu1 }
 0x4b5   :  { %v1898_v43 = vsel %vm1894_vm15, %v1870_v13, 0.0  ;;  %v1868_v14 = vadd.f32 %v2296_v16, %v2027_v34  ;;  %v1845_v9 = vpop.f32.mrb[11].mxu1 }
 0x4b6   :  { %v1903_v19 = vsel %vm1901_vm14, %v1898_v43, 0.0  ;;  %v1918_v20 = vmul.f32 %v1898_v43, %v1898_v43  ;;  %v1897_v21 = vsel %vm1893_vm0, %v1869_v15, 0.0  ;;  %v1867_v22 = vadd.f32 %v2027_v34, %v1845_v9 }
 0x4b7   :  { %v1902_v23 = vsel %vm1901_vm14, %v1897_v21, 0.0  ;;  %v1917_v24 = vmul.f32 %v1897_v21, %v1897_v21  ;;  %v1872_v25 = vmax.f32 %v1868_v14, 0.0 }
 0x4b8   :  { %v1922_v26 = vsel %vm1901_vm14, %v1918_v20, 0.0  ;;  %v1904_v27 = vadd.f32 %v1903_v19, %v1902_v23  ;;  %v1871_v28 = vmax.f32 %v1867_v22, 0.0 }
 0x4b9   :  { %v1921_v51 = vsel %vm1901_vm14, %v1917_v24, 0.0  ;;  %v1900_v29 = vsel %vm1896_vm1, %v1872_v25, 0.0 }
 0x4ba   :  { %v1923_v30 = vadd.f32 %v1922_v26, %v1921_v51  ;;  %v1899_v31 = vsel %vm1895_vm2, %v1871_v28, 0.0  ;;  %v1920_v32 = vmul.f32 %v1900_v29, %v1900_v29  ;;  %v1907_v37 = vsel %vm1901_vm14, %v1900_v29, 0.0 }
 0x4bb   :  { %v1905_v33 = vsel %vm1901_vm14, %v1899_v31, 0.0  ;;  %v1919_v35 = vmul.f32 %v1899_v31, %v1899_v31 }
 0x4bc   :  { %v1906_v36 = vadd.f32 %v1905_v33, %v1904_v27  ;;  %v1926_v42 = vsel %vm1901_vm14, %v1920_v32, 0.0 }
 0x4bd   :  { %v1924_v39 = vsel %vm1901_vm14, %v1919_v35, 0.0 }
 0x4be   :  { %v1908_v40 = vadd.f32 %v1907_v37, %v1906_v36  ;;  %v1925_v41 = vadd.f32 %v1924_v39, %v1923_v30 }
 0x4c0   :  { %v1909_v44 = vrot.slane %v1908_v40, 4  ;;  %v1927_v45 = vadd.f32 %v1926_v42, %v1925_v41 }
 0x4c2   :  { %v1910_v46 = vadd.f32 %v1909_v44, %v1908_v40  ;;  %v1928_v47 = vrot.slane %v1927_v45, 4 }
 0x4c4   :  { %v1911_v49 = vrot.slane %v1910_v46, 2  ;;  %v1929_v50 = vadd.f32 %v1928_v47, %v1927_v45 }
 0x4c6   :  { %v1912_v52 = vadd.f32 %v1911_v49, %v1910_v46  ;;  %v1930_v53 = vrot.slane %v1929_v50, 2 }
 0x4c8   :  { %v1913_v55 = vrot.slane %v1912_v52, 1  ;;  %v1931_v57 = vadd.f32 %v1930_v53, %v1929_v50 }
 0x4ca   :  { %v1914_v58 = vadd.f32 %v1913_v55, %v1912_v52  ;;  %v1932_v56 = vrot.slane %v1931_v57, 1 }
 0x4cc   :  { %v1916_v48 = vmul.f32 0.05, %v1914_v58  ;;  %v1933_v59 = vadd.f32 %v1932_v56, %v1931_v57 }
 0x4ce   :  { %v1934_v61 = vmul.f32 0.05, %v1933_v59  ;;  %v1935_v62 = vmul.f32 %v1916_v48, %v1916_v48 }
 0x4d0   :  { %v1936_v63 = vsub.f32 %v1934_v61, %v1935_v62 }
 0x4d2   :  { %v1937_v0 = vmax.f32 %v1936_v63, 0.0 }
 0x4d4   :  { %v1938_v1 = vadd.f32 1e-05, %v1937_v0 }
 0x4d6   :  { %2421 = vrsqrt.f32 %v1938_v1 }
 0x4e0   :  { %v2422_v3 = vpop.eup %2421 }
 0x4e1   :  { %v1941_v4 = vmul.f32 %v2422_v3, %v1940_v2 }
 0x4e3   :  { %v1943_v54 = vmul.f32 %v1941_v4, %v1916_v48  ;;  %v1948_v38 = vrot.slane %v1941_v4, %v2699_v60 }
 0x4e5   :  { %v1944_v34 = vsub.f32 %v1942_v5, %v1943_v54  ;;  %v1949_v6 = vmul.f32 %v1948_v38, %v1897_v21  ;;  %v1950_v7 = vmul.f32 %v1948_v38, %v1898_v43  ;;  %v1951_v8 = vmul.f32 %v1948_v38, %v1899_v31 }
 0x4e6   :  { %v1952_v10 = vmul.f32 %v1948_v38, %v1900_v29 }
 0x4e7   :  { %v1957_v11 = vrot.slane %v1944_v34, %v2699_v60 }
 0x4e9   :  { %v1959_v12 = vadd.f32 %v1957_v11, %v1949_v6  ;;  %v1960_v13 = vadd.f32 %v1957_v11, %v1950_v7  ;;  %v1961_v15 = vadd.f32 %v1957_v11, %v1951_v8  ;;  %v1962_v16 = vadd.f32 %v1957_v11, %v1952_v10 }
 0x4eb   :  { %1963 = vst.msk [vmem:[%s2846_s15] sm:$0xff] %vm1901_vm14, %v1959_v12  ;;  %2028 = vst.msk [vmem:[%s2846_s15 + $0x10] sm:$0xff] %vm1901_vm14, %v1961_v15 }
 0x4ec   :  { %1965 = vst.msk [vmem:[%s2846_s15 + $0x8] sm:$0x3] %vm1964_vm3, %v1960_v13  ;;  %2029 = vst.msk [vmem:[%s2846_s15 + $0x18] sm:$0x3] %vm1964_vm3, %v1962_v16 }

</bundles_post_ra>
